<compile_context>
chip_gen: v5e
topology: v5e:2x2
jax: 0.10.0
libtpu: 0.0.40
codegen_flags: <defaults>
</compile_context>

<pallas_src>
import numpy as np
import jax
import jax.numpy as jnp
from jax.experimental import pallas as pl
from jax.experimental.pallas import tpu as pltpu


_LANE = 128


def _round_up(x, m):
    return (x + m - 1) // m * m


def _chip_profile():
    """(num_core_splits, per-input tile bytes, scoped vmem limit) per TPU generation."""
    kind = ""
    try:
        kind = jax.devices()[0].device_kind.lower()
    except Exception:
        pass
    if "v7" in kind or "7x" in kind:              # v7x: 2 TCs, 64 MiB VMEM, ~3.2 TB/s
        return 2, 6 << 20, 48 << 20
    if "v6" in kind:                              # v6e: 1 TC, 128 MiB VMEM
        return 1, 4 << 20, 32 << 20
    if "v5 lite" in kind or "v5e" in kind or "v5lite" in kind:   # v5e: 1 TC
        return 1, 2 << 20, 32 << 20
    if "v4" in kind or "v5" in kind:              # v4 / v5p megacore: 2 TCs
        return 2, 4 << 20, 32 << 20
    return 2, 2 << 20, 32 << 20                   # unknown: safe everywhere


def _make_kernel(*, N, tile_n, tiles_per_core, needs_mask, Z, nC, has_delta, z_capacity):
    # static slab column layout
    lv_off = 0
    d_off = Z
    rep_off = Z * (2 if has_delta else 1)
    con_off = rep_off + nC
    w_off = con_off + nC

    def kernel(slab_ref, recs_ref, inp_ref, out_ref, acc_ref):
        c = pl.program_id(0)
        t = pl.program_id(1)
        gb = c * tiles_per_core + t                     # logical (unclamped) block index

        # ---- streaming MSE partial: per-core VMEM vector accumulator ----
        @pl.when(t == 0)
        def _():
            acc_ref[...] = jnp.zeros_like(acc_ref)

        def accumulate(masked):
            diff = recs_ref[...].astype(jnp.float32) - inp_ref[...].astype(jnp.float32)
            if masked:
                row = jax.lax.broadcasted_iota(jnp.int32, diff.shape, 0)
                diff = jnp.where(gb * tile_n + row < N, diff, 0.0)
            # reduce only over the leading axis (vreg-wise adds); cross-lane reduce is
            # deferred to the epilogue.
            acc_ref[...] += jnp.sum(diff * diff, axis=0)

        if needs_mask:
            is_full = (gb + 1) * tile_n <= N

            @pl.when(is_full)
            def _():
                accumulate(False)

            @pl.when(jnp.logical_not(is_full))
            def _():
                accumulate(True)
        else:
            accumulate(False)

        # ---- tiny KLD / concept-BCE work: once per core, from the resident slab ----
        @pl.when(t == tiles_per_core - 1)
        def _():
            sse = jnp.sum(acc_ref[...])                 # per-core sum-of-squares

            slab = slab_ref[...]
            lv = slab[:, lv_off:lv_off + Z]
            inner = 1.0 + lv - jnp.exp(lv)
            if has_delta:
                dd = slab[:, d_off:d_off + Z]
                inner = inner - dd * dd
            kld_row = -0.5 * jnp.sum(inner, axis=1, keepdims=True)    # (B, 1)
            kld_sum = jnp.sum(jnp.abs(kld_row - z_capacity))          # wrapper / B

            logits = slab[:, rep_off:rep_off + nC]
            tgt = slab[:, con_off:con_off + nC]
            w = slab[:, w_off:w_off + nC]                             # 0 on unselected cols
            # stable BCE-with-logits: max(x,0) - x*t + log1p(exp(-|x|))
            bce = (jnp.maximum(logits, 0.0) - logits * tgt
                   + jnp.log1p(jnp.exp(-jnp.abs(logits))))
            bce_sum = jnp.sum(bce * w)                                # wrapper * 1/(B*K)

            sub = jax.lax.broadcasted_iota(jnp.int32, out_ref.shape, 1)
            lane = jax.lax.broadcasted_iota(jnp.int32, out_ref.shape, 2)
            vals = jnp.where(lane == 0, sse,
                   jnp.where(lane == 1, kld_sum,
                   jnp.where(lane == 2, bce_sum, 0.0)))
            out_ref[...] = jnp.where(sub == 0, vals, 0.0)

    return kernel


def beta_vae_loss(out_dict, *, beta, z_capacity, w_c, used_c=6, model=None):
    recs = out_dict['RECS']
    inputs = out_dict['INPUTS']
    mus = out_dict['MUS'].astype(jnp.float32)
    logvars = out_dict['LOGVARS'].astype(jnp.float32)
    reprs_src = (out_dict['LOGITS'] if model == 'betaplusglancenet'
                 else out_dict['LATENTS']).astype(jnp.float32)
    concepts = out_dict['CONCEPTS'].astype(jnp.float32)
    mu_cluster = out_dict.get('mu_cluster', None)
    ce_weight = out_dict.get('CE_WEIGHT', None)

    assert recs.shape == inputs.shape
    B = recs.shape[0]
    total_elems = int(np.prod(recs.shape))
    F = total_elems // B

    # ---- stream recon tensors in (near-)native layout: only leading dims collapsed ----
    # Collapsing the *major* dims of a row-major array is layout-preserving (no HBM
    # relayout copy); the old flatten to (B, F) touched the minor dims and forced one.
    if recs.ndim >= 3:
        P, Q = int(recs.shape[-2]), int(recs.shape[-1])
        N = total_elems // (P * Q)
    elif recs.ndim == 2:
        # TODO(synk): very large 2D inputs are streamed as a single block; tile over the
        # lane dim instead if B*F does not fit VMEM.
        N, P, Q = 1, int(recs.shape[0]), int(recs.shape[1])
    else:
        N, P, Q = 1, 1, int(recs.shape[0])
    recs_s = recs.reshape(N, P, Q)
    inp_s = inputs.reshape(N, P, Q)

    Z = mus.shape[-1]
    nC = concepts.shape[-1]
    reprs = reprs_src[:, :nC]
    has_delta = mu_cluster is not None

    # ---- glue: column-selection mask, per-column BCE weights, divisor ----
    mask = concepts[0, :] != -1.0
    weights = (ce_weight.astype(jnp.float32) if ce_weight is not None
               else jnp.ones((nC,), jnp.float32))
    cum = jnp.cumsum(mask.astype(jnp.int32))
    sel = jnp.logical_and(mask, cum <= used_c)            # first used_c unmasked columns
    w_eff = jnp.where(sel, weights, 0.0)
    k = jnp.sum(sel.astype(jnp.float32))
    inv_bce = jnp.where(k > 0, 1.0 / (B * k), 0.0).astype(jnp.float32)

    # ---- pack all tiny tensors into one lane-padded resident slab (single DMA) ----
    parts = [logvars]
    if has_delta:
        parts.append(mus - mu_cluster.astype(jnp.float32))
    parts.extend([reprs, concepts, jnp.broadcast_to(w_eff[None, :], (B, nC))])
    slab = jnp.concatenate(parts, axis=1).astype(jnp.float32)
    L = _round_up(slab.shape[1], _LANE)
    slab = jnp.pad(slab, ((0, 0), (0, L - slab.shape[1])))

    # ---- tiling over the leading (collapsed) dim; generation-specific tile size ----
    ncores, tile_bytes, vmem_limit = _chip_profile()
    itemsize = max(jnp.dtype(recs.dtype).itemsize, jnp.dtype(inputs.dtype).itemsize)
    row_bytes = max(1, P * Q * itemsize)
    tile_n = max(1, min(N, tile_bytes // row_bytes))
    n_blocks = -(-N // tile_n)
    ncores = max(1, min(ncores, n_blocks))                 # never more splits than blocks
    tiles_per_core = -(-n_blocks // ncores)
    needs_mask = (ncores * tiles_per_core * tile_n) != N

    if needs_mask:
        def data_map(c, t):
            # clamp out-of-range blocks; the kernel masks their rows to 0
            return (jnp.minimum(c * tiles_per_core + t, n_blocks - 1), 0, 0)
    else:
        def data_map(c, t):
            return (c * tiles_per_core + t, 0, 0)

    kernel = _make_kernel(N=N, tile_n=tile_n, tiles_per_core=tiles_per_core,
                          needs_mask=needs_mask, Z=Z, nC=nC,
                          has_delta=has_delta, z_capacity=float(z_capacity))

    cost = pl.CostEstimate(
        flops=3 * total_elems + 8 * B * (Z + nC),
        transcendentals=B * (Z + 2 * nC),
        bytes_accessed=(total_elems * int(jnp.dtype(recs.dtype).itemsize)
                        + total_elems * int(jnp.dtype(inputs.dtype).itemsize)
                        + int(slab.size) * 4 + ncores * 8 * _LANE * 4),
    )

    partials = pl.pallas_call(
        kernel,
        out_shape=jax.ShapeDtypeStruct((ncores, 8, _LANE), jnp.float32),
        grid_spec=pltpu.PrefetchScalarGridSpec(
            num_scalar_prefetch=0,
            grid=(ncores, tiles_per_core),
            in_specs=[
                pl.BlockSpec((B, L), lambda c, t: (0, 0)),     # resident tiny-tensor slab
                pl.BlockSpec((tile_n, P, Q), data_map),        # recs   (native dtype/layout)
                pl.BlockSpec((tile_n, P, Q), data_map),        # inputs (native dtype/layout)
            ],
            out_specs=pl.BlockSpec((1, 8, _LANE), lambda c, t: (c, 0, 0)),
            scratch_shapes=[pltpu.VMEM((P, Q), jnp.float32)],  # per-core vector SSE acc
        ),
        compiler_params=pltpu.CompilerParams(
            dimension_semantics=("parallel", "arbitrary"),
            vmem_limit_bytes=vmem_limit,
        ),
        cost_estimate=cost,
    )(slab, recs_s, inp_s)

    recon = jnp.sum(partials[:, 0, 0]) * jnp.float32(1.0 / (B * F))
    kld = partials[0, 0, 1] * jnp.float32(1.0 / B)
    closs = partials[0, 0, 2] * inv_bce

    total = recon + beta * kld
    losses = {'recon-loss': recon, 'kld': kld}
    if w_c > 0:
        total = total + w_c * closs
        losses['c-loss'] = closs
    return total, losses


def _numpy_reference(recs, inputs, mus, logvars, mu_cluster, latents, concepts,
                     beta, z_capacity, w_c, used_c):
    recs = np.asarray(recs, np.float32)
    inputs = np.asarray(inputs, np.float32)
    mus = np.asarray(mus, np.float32)
    logvars = np.asarray(logvars, np.float32)
    concepts = np.asarray(concepts, np.float32)
    latents = np.asarray(latents, np.float32)
    recon = np.mean((recs - inputs) ** 2)
    d = mus - np.asarray(mu_cluster, np.float32)
    kld = np.mean(np.abs(-0.5 * np.sum(1 + logvars - d ** 2 - np.exp(logvars), axis=1)
                         - z_capacity))
    nC = concepts.shape[-1]
    reprs = latents[:, :nC]
    mask = concepts[0, :] != -1
    cols = np.where(mask)[0][:used_c]
    if cols.size > 0:
        p = 1.0 / (1.0 + np.exp(-reprs[:, cols]))
        t = concepts[:, cols]
        closs = np.mean(-(t * np.log(p) + (1 - t) * np.log(1 - p)))
    else:
        closs = 0.0
    return recon + beta * kld + w_c * closs


if __name__ == "__main__":
    key = jax.random.PRNGKey(0)
    k1, k2, k3, k4, k5, k6 = jax.random.split(key, 6)

    B, C, H, W = 2, 4, 16, 16
    Z, nC, usedC = 12, 8, 6
    beta, z_capacity, w_c = 4.0, 0.5, 1.0

    inputs = jax.random.uniform(k1, (B, C, H, W), jnp.float32)        # NCHW
    recs = jnp.clip(inputs + 0.05 * jax.random.normal(k2, (B, C, H, W)), 0.0, 1.0)
    mus = 0.5 * jax.random.normal(k3, (B, Z), jnp.float32)
    logvars = 0.1 * jax.random.normal(k4, (B, Z), jnp.float32)
    mu_cluster = 0.2 * jax.random.normal(k5, (B, Z), jnp.float32)
    latents = mus                                                     # LATENTS = mus
    concepts = jax.random.bernoulli(k6, 0.5, (B, nC)).astype(jnp.float32)
    concepts = concepts.at[:, 2].set(-1.0)                            # one unknown column

    out_dict = {
        'RECS': recs, 'INPUTS': inputs, 'MUS': mus, 'LOGVARS': logvars,
        'LATENTS': latents, 'CONCEPTS': concepts, 'mu_cluster': mu_cluster,
        'CE_WEIGHT': None,
    }

    total, losses = beta_vae_loss(out_dict, beta=beta, z_capacity=z_capacity,
                                  w_c=w_c, used_c=usedC)
    total = jax.block_until_ready(total)

    ref = _numpy_reference(recs, inputs, mus, logvars, mu_cluster, latents, concepts,
                           beta, z_capacity, w_c, usedC)
    np.testing.assert_allclose(np.asarray(total), ref, rtol=1e-4, atol=1e-4)

    print("KERNEL_OK")
</pallas_src>

<mosaic_0001>
module attributes {stable_mosaic.version = 11 : i64} {
  func.func @kernel(%arg0: i32, %arg1: i32, %arg2: memref<2x128xf32, #tpu.memory_space<vmem>>, %arg3: memref<8x16x16xf32, #tpu.memory_space<vmem>>, %arg4: memref<8x16x16xf32, #tpu.memory_space<vmem>>, %arg5: memref<1x8x128xf32, #tpu.memory_space<vmem>>, %arg6: memref<16x16xf32, #tpu.memory_space<vmem>>) attributes {dimension_semantics = [#tpu.dimension_semantics<parallel>, #tpu.dimension_semantics<arbitrary>], iteration_bounds = array<i64: 1, 1>, scalar_prefetch = 0 : i64, scratch_operands = 1 : i64, tpu.core_type = #tpu.core_type<tc>, window_params = [{pipeline_mode = #tpu.pipeline_mode<synchronous>, transform_indices = @transform_0, window_bounds = array<i64: 2, 128>}, {transform_indices = @transform_1, window_bounds = array<i64: 8, 16, 16>}, {transform_indices = @transform_2, window_bounds = array<i64: 8, 16, 16>}, {transform_indices = @transform_3, window_bounds = array<i64: 1, 8, 128>}]} {
    %c0_i32 = arith.constant 0 : i32
    %0 = arith.cmpi eq, %arg1, %c0_i32 : i32
    %1 = arith.extui %0 : i1 to i32
    %c0_i32_0 = arith.constant 0 : i32
    %2 = arith.cmpi ne, %1, %c0_i32_0 : i32
    scf.if %2 {
      %cst_12 = arith.constant 0.000000e+00 : f32
      %14 = vector.broadcast %cst_12 : f32 to vector<16x16xf32>
      %c0_13 = arith.constant 0 : index
      %c0_14 = arith.constant 0 : index
      %15 = vector.load %arg6[%c0_13, %c0_14] : memref<16x16xf32, #tpu.memory_space<vmem>>, vector<16x16xf32>
      tpu.vector_store %arg6[%c0_13, %c0_14], %14 {strides = array<i32>} : memref<16x16xf32, #tpu.memory_space<vmem>>, vector<16x16xf32>,
    } else {
    }
    %c0 = arith.constant 0 : index
    %c0_1 = arith.constant 0 : index
    %c0_2 = arith.constant 0 : index
    %3 = vector.load %arg3[%c0, %c0_1, %c0_2] : memref<8x16x16xf32, #tpu.memory_space<vmem>>, vector<8x16x16xf32>
    %c0_3 = arith.constant 0 : index
    %c0_4 = arith.constant 0 : index
    %c0_5 = arith.constant 0 : index
    %4 = vector.load %arg4[%c0_3, %c0_4, %c0_5] : memref<8x16x16xf32, #tpu.memory_space<vmem>>, vector<8x16x16xf32>
    %5 = arith.subf %3, %4 : vector<8x16x16xf32>
    %c0_6 = arith.constant 0 : index
    %c0_7 = arith.constant 0 : index
    %6 = vector.load %arg6[%c0_6, %c0_7] : memref<16x16xf32, #tpu.memory_space<vmem>>, vector<16x16xf32>
    %7 = arith.mulf %5, %5 : vector<8x16x16xf32>
    %cst = arith.constant dense<0.000000e+00> : vector<16x16xf32>
    %8 = vector.multi_reduction <add>, %7, %cst [0] : vector<8x16x16xf32> to vector<16x16xf32>
    %9 = arith.addf %6, %8 : vector<16x16xf32>
    %c0_8 = arith.constant 0 : index
    %c0_9 = arith.constant 0 : index
    %10 = vector.load %arg6[%c0_8, %c0_9] : memref<16x16xf32, #tpu.memory_space<vmem>>, vector<16x16xf32>
    tpu.vector_store %arg6[%c0_8, %c0_9], %9 {strides = array<i32>} : memref<16x16xf32, #tpu.memory_space<vmem>>, vector<16x16xf32>,
    %c0_i32_10 = arith.constant 0 : i32
    %11 = arith.cmpi eq, %arg1, %c0_i32_10 : i32
    %12 = arith.extui %11 : i1 to i32
    %c0_i32_11 = arith.constant 0 : i32
    %13 = arith.cmpi ne, %12, %c0_i32_11 : i32
    scf.if %13 {
      %c0_12 = arith.constant 0 : index
      %c0_13 = arith.constant 0 : index
      %14 = vector.load %arg6[%c0_12, %c0_13] : memref<16x16xf32, #tpu.memory_space<vmem>>, vector<16x16xf32>
      %15 = vector.shape_cast %14 : vector<16x16xf32> to vector<1x16x16xf32>
      %cst_14 = arith.constant dense<0.000000e+00> : vector<1xf32>
      %16 = vector.multi_reduction <add>, %15, %cst_14 [1, 2] : vector<1x16x16xf32> to vector<1xf32>
      %17 = vector.shape_cast %16 : vector<1xf32> to vector<1x1x1xf32>
      %18 = vector.extract %17[0, 0, 0] : f32 from vector<1x1x1xf32>
      %c0_15 = arith.constant 0 : index
      %c0_16 = arith.constant 0 : index
      %19 = vector.load %arg2[%c0_15, %c0_16] : memref<2x128xf32, #tpu.memory_space<vmem>>, vector<2x128xf32>
      %20 = vector.extract_strided_slice %19 {offsets = [0, 0], sizes = [2, 12], strides = [1, 1]} : vector<2x128xf32> to vector<2x12xf32>
      %cst_17 = arith.constant 1.000000e+00 : f32
      %21 = vector.broadcast %cst_17 : f32 to vector<2x12xf32>
      %22 = arith.addf %21, %20 : vector<2x12xf32>
      %23 = math.exp %20 : vector<2x12xf32>
      %24 = arith.subf %22, %23 : vector<2x12xf32>
      %25 = vector.extract_strided_slice %19 {offsets = [0, 12], sizes = [2, 12], strides = [1, 1]} : vector<2x128xf32> to vector<2x12xf32>
      %26 = arith.mulf %25, %25 : vector<2x12xf32>
      %27 = arith.subf %24, %26 : vector<2x12xf32>
      %cst_18 = arith.constant dense<0.000000e+00> : vector<2xf32>
      %28 = vector.multi_reduction <add>, %27, %cst_18 [1] : vector<2x12xf32> to vector<2xf32>
      %29 = vector.shape_cast %28 : vector<2xf32> to vector<2x1xf32>
      %cst_19 = arith.constant -5.000000e-01 : f32
      %30 = vector.broadcast %cst_19 : f32 to vector<2x1xf32>
      %31 = arith.mulf %30, %29 : vector<2x1xf32>
      %cst_20 = arith.constant 5.000000e-01 : f32
      %32 = vector.broadcast %cst_20 : f32 to vector<2x1xf32>
      %33 = arith.subf %31, %32 : vector<2x1xf32>
      %34 = math.absf %33 : vector<2x1xf32>
      %35 = vector.shape_cast %34 : vector<2x1xf32> to vector<1x2x1xf32>
      %cst_21 = arith.constant dense<0.000000e+00> : vector<1xf32>
      %36 = vector.multi_reduction <add>, %35, %cst_21 [1, 2] : vector<1x2x1xf32> to vector<1xf32>
      %37 = vector.shape_cast %36 : vector<1xf32> to vector<1x1x1xf32>
      %38 = vector.extract %37[0, 0, 0] : f32 from vector<1x1x1xf32>
      %39 = vector.extract_strided_slice %19 {offsets = [0, 24], sizes = [2, 8], strides = [1, 1]} : vector<2x128xf32> to vector<2x8xf32>
      %40 = vector.extract_strided_slice %19 {offsets = [0, 32], sizes = [2, 8], strides = [1, 1]} : vector<2x128xf32> to vector<2x8xf32>
      %41 = vector.extract_strided_slice %19 {offsets = [0, 40], sizes = [2, 8], strides = [1, 1]} : vector<2x128xf32> to vector<2x8xf32>
      %cst_22 = arith.constant 0.000000e+00 : f32
      %42 = vector.broadcast %cst_22 : f32 to vector<2x8xf32>
      %43 = arith.maximumf %39, %42 : vector<2x8xf32>
      %44 = arith.mulf %39, %40 : vector<2x8xf32>
      %45 = arith.subf %43, %44 : vector<2x8xf32>
      %46 = math.absf %39 : vector<2x8xf32>
      %cst_23 = arith.constant 0.000000e+00 : f32
      %47 = vector.broadcast %cst_23 : f32 to vector<2x8xf32>
      %48 = arith.subf %47, %46 : vector<2x8xf32>
      %49 = math.exp %48 : vector<2x8xf32>
      %50 = math.log1p %49 : vector<2x8xf32>
      %51 = arith.addf %45, %50 : vector<2x8xf32>
      %52 = arith.mulf %51, %41 : vector<2x8xf32>
      %53 = vector.shape_cast %52 : vector<2x8xf32> to vector<1x2x8xf32>
      %cst_24 = arith.constant dense<0.000000e+00> : vector<1xf32>
      %54 = vector.multi_reduction <add>, %53, %cst_24 [1, 2] : vector<1x2x8xf32> to vector<1xf32>
      %55 = vector.shape_cast %54 : vector<1xf32> to vector<1x1x1xf32>
      %56 = vector.extract %55[0, 0, 0] : f32 from vector<1x1x1xf32>
      %57 = tpu.iota {dimensions = array<i32: 1>} : vector<1x8x128xi32>
      %58 = tpu.iota {dimensions = array<i32: 2>} : vector<1x8x128xi32>
      %c0_i32_25 = arith.constant 0 : i32
      %59 = vector.broadcast %c0_i32_25 : i32 to vector<1x8x128xi32>
      %60 = arith.cmpi eq, %58, %59 : vector<1x8x128xi32>
      %c1_i32 = arith.constant 1 : i32
      %61 = vector.broadcast %c1_i32 : i32 to vector<1x8x128xi32>
      %62 = arith.cmpi eq, %58, %61 : vector<1x8x128xi32>
      %c2_i32 = arith.constant 2 : i32
      %63 = vector.broadcast %c2_i32 : i32 to vector<1x8x128xi32>
      %64 = arith.cmpi eq, %58, %63 : vector<1x8x128xi32>
      %cst_26 = arith.constant 0.000000e+00 : f32
      %65 = vector.broadcast %56 : f32 to vector<1x8x128xf32>
      %66 = vector.broadcast %cst_26 : f32 to vector<1x8x128xf32>
      %67 = arith.select %64, %65, %66 : vector<1x8x128xi1>, vector<1x8x128xf32>
      %68 = vector.broadcast %38 : f32 to vector<1x8x128xf32>
      %69 = arith.select %62, %68, %67 : vector<1x8x128xi1>, vector<1x8x128xf32>
      %70 = vector.broadcast %18 : f32 to vector<1x8x128xf32>
      %71 = arith.select %60, %70, %69 : vector<1x8x128xi1>, vector<1x8x128xf32>
      %c0_i32_27 = arith.constant 0 : i32
      %72 = vector.broadcast %c0_i32_27 : i32 to vector<1x8x128xi32>
      %73 = arith.cmpi eq, %57, %72 : vector<1x8x128xi32>
      %cst_28 = arith.constant 0.000000e+00 : f32
      %74 = vector.broadcast %cst_28 : f32 to vector<1x8x128xf32>
      %75 = arith.select %73, %71, %74 : vector<1x8x128xi1>, vector<1x8x128xf32>
      %c0_29 = arith.constant 0 : index
      %c0_30 = arith.constant 0 : index
      %c0_31 = arith.constant 0 : index
      %76 = vector.load %arg5[%c0_29, %c0_30, %c0_31] : memref<1x8x128xf32, #tpu.memory_space<vmem>>, vector<1x8x128xf32>
      tpu.vector_store %arg5[%c0_29, %c0_30, %c0_31], %75 {strides = array<i32>} : memref<1x8x128xf32, #tpu.memory_space<vmem>>, vector<1x8x128xf32>,
    } else {
    }
    return
  }
  func.func @transform_0(%arg0: i32, %arg1: i32) -> (i32, i32) {
    %c0_i32 = arith.constant 0 : i32
    %c0_i32_0 = arith.constant 0 : i32
    %c0_i32_1 = arith.constant 0 : i32
    return %c0_i32, %c0_i32_0 : i32, i32
  }
  func.func @transform_1(%arg0: i32, %arg1: i32) -> (i32, i32, i32) {
    %c1_i32 = arith.constant 1 : i32
    %0 = arith.muli %arg0, %c1_i32 : i32
    %1 = arith.addi %0, %arg1 : i32
    %c0_i32 = arith.constant 0 : i32
    %c0_i32_0 = arith.constant 0 : i32
    %c0_i32_1 = arith.constant 0 : i32
    return %1, %c0_i32, %c0_i32_0 : i32, i32, i32
  }
  func.func @transform_2(%arg0: i32, %arg1: i32) -> (i32, i32, i32) {
    %c1_i32 = arith.constant 1 : i32
    %0 = arith.muli %arg0, %c1_i32 : i32
    %1 = arith.addi %0, %arg1 : i32
    %c0_i32 = arith.constant 0 : i32
    %c0_i32_0 = arith.constant 0 : i32
    %c0_i32_1 = arith.constant 0 : i32
    return %1, %c0_i32, %c0_i32_0 : i32, i32, i32
  }
  func.func @transform_3(%arg0: i32, %arg1: i32) -> (i32, i32, i32) {
    %c0_i32 = arith.constant 0 : i32
    %c0_i32_0 = arith.constant 0 : i32
    %c0_i32_1 = arith.constant 0 : i32
    return %arg0, %c0_i32, %c0_i32_0 : i32, i32, i32
  }
}

</mosaic_0001>

<bundles_post_ra>
// kernel: tpu_custom_call.1
= control target key start
LH: loop header
LB: loop body
LE: loop exit
PB: predicated region body
PF: predicated region fallthrough
CT: control target
= control target key end

     0   :  { %8 = vsyncpa [#allocation4], 0  ;;  %s520_s0 = inlined_call_operand.hbm [shape: f32[2,128], index: 0, kind: input, shape index: {}]   ;;  %s521_s1 = inlined_call_operand.hbm [shape: f32[8,16,16], index: 1, kind: input, shape index: {}]   ;;  %s522_s2 = inlined_call_operand.hbm [shape: f32[8,16,16], index: 2, kind: input, shape index: {}]   ;;  %s523_s3 = inlined_call_operand.hbm [shape: f32[1,8,128], index: 3, kind: output, shape index: {}]  }
   0x1   :  { %9 = vsyncpa [#allocation7], 0  ;;  %s31_s14 = sshll.u32 %s521_s1, 4  ;;  %s32_s14 = int_to_ptr.hbm [resolvable:$true] %s31_s14 }
   0x2   :  { %10 = vsyncpa [#allocation5], 0  ;;  %s428_s15 = smov [#allocation6]   ;;  %s16_s19 = sshll.u32 %s520_s0, 4  ;;  %s17_s19 = int_to_ptr.hbm [resolvable:$true] %s16_s19 }
   0x3   :  { %s33_s16 = sshll.u32 %s428_s15, 4  ;;  %s429_s20 = smov 128   ;;  %s34_s16 = int_to_ptr.vmem [resolvable:$true] %s33_s16 }
   0x4   :  { %s430_s21 = smov 8   ;;  %s431_s22 = smov [#allocation3]  }
   0x5   :  { %39 = dma.hbm_to_vmem [thread:$0]  %s32_s14, 2048, %s34_s16, [#allocation7], %s429_s20, %s429_s20, %s430_s21  }
   0x6   :  { %s18_s23 = sshll.u32 %s431_s22, 4  ;;  %s49_s26 = sshll.u32 %s522_s2, 4  ;;  %s19_s23 = int_to_ptr.vmem [resolvable:$true] %s18_s23  ;;  %s50_s26 = int_to_ptr.hbm [resolvable:$true] %s49_s26 }
   0x7   :  { %21 = dma.hbm_to_vmem [thread:$0]  %s17_s19, 32, %s19_s23, [#allocation4]  }
   0x8   :  { %s432_s1 = smov [#allocation8]  }
   0x9   :  { %s51_s27 = sshll.u32 %s432_s1, 4  ;;  %s52_s27 = int_to_ptr.vmem [resolvable:$true] %s51_s27 }
   0xa   :  { %57 = dma.hbm_to_vmem [thread:$0]  %s50_s26, 2048, %s52_s27, [#allocation7], %s429_s20, %s429_s20, %s430_s21  }
   0xb   :  { %422 = dma.done.wait [#allocation4], 32  }
   0xc   :  { %423 = vsyncadd [#allocation4], 4294967264 }
   0xd   :  { %424 = dma.done.wait [#allocation7], 4096  }
   0xe   :  { %425 = vsyncadd [#allocation7], 4294963200  ;;  %v468_v0 = vld [vmem:[#allocation3] sm:$0x3]  ;;  %s433_s0 = smov 112   ;;  %s434_s2 = smov 116  }
   0xf   :  { %v204_v1 = vmul.f32 %v468_v0, %v468_v0  ;;  %249 = vrot.lane.b32.xlu1 %v468_v0, %s433_s0  ;;  %s435_s28 = smov 120   ;;  %v235_v2 = vand.u32 2147483647, %v468_v0  ;;  %v201_v5 = vmul.f32 1.442695, %v468_v0  ;;  %vm78_vm0 = vcmask 130048  }
  0x10   :  { %v436_v6 = vmov 0.0   ;;  %v81_v8 = vld [vmem:[#allocation6] sm:$0xff]  ;;  %v82_v9 = vld [vmem:[#allocation6 + $0x8] sm:$0xff]  ;;  %v83_v10 = vld [vmem:[#allocation6 + $0x10] sm:$0xff]  ;;  %v481_v14 = vadd.f32 1.0, %v468_v0  ;;  %vm210_vm1 = vcmask 91136  }
  0x11   :  { %206 = vrot.lane.b32.xlu0 %v204_v1, %s434_s2  ;;  %v236_v3 = vsub.f32 0.0, %v235_v2  ;;  %79 = vst.msk [vmem:[#allocation2] sm:$0xff] %vm78_vm0, %v436_v6  ;;  %v84_v11 = vld [vmem:[#allocation6 + $0x18] sm:$0xff]  ;;  %v85_v12 = vld [vmem:[#allocation6 + $0x20] sm:$0xff]  ;;  %v86_v13 = vld [vmem:[#allocation6 + $0x28] sm:$0xff]  ;;  %s437_s29 = smov 104  }
  0x12   :  { %80 = vst.msk [vmem:[#allocation2 + $0x8] sm:$0xff] %vm78_vm0, %v436_v6  ;;  %v87_v15 = vld [vmem:[#allocation6 + $0x30] sm:$0xff]  ;;  %v97_v16 = vld [vmem:[#allocation8] sm:$0xff]  ;;  %v98_v17 = vld [vmem:[#allocation8 + $0x8] sm:$0xff]  ;;  %vm257_vm3 = vcmask 58368   ;;  %vm217_vm4 = vcmask 1024  }
  0x13   :  { %v237_v4 = vmul.f32 1.442695, %v236_v3  ;;  %v88_v20 = vld [vmem:[#allocation6 + $0x38] sm:$0xff]  ;;  %v89_v21 = vld [vmem:[#allocation6 + $0x40] sm:$0xff]  ;;  %v99_v22 = vld [vmem:[#allocation8 + $0x10] sm:$0xff]  ;;  %v113_v25 = vsub.f32 %v81_v8, %v97_v16  ;;  %v114_v36 = vsub.f32 %v82_v9, %v98_v17  ;;  %s438_s6 = smov [#allocation9]  }
  0x14   :  { %v100_v23 = vld [vmem:[#allocation8 + $0x18] sm:$0xff]  ;;  %v101_v24 = vld [vmem:[#allocation8 + $0x20] sm:$0xff]  ;;  %v90_v26 = vld [vmem:[#allocation6 + $0x48] sm:$0xff]  ;;  %v115_v30 = vsub.f32 %v83_v10, %v99_v22  ;;  %s289_s7 = sshll.u32 %s438_s6, 4  ;;  %s291_s10 = sshll.u32 %s523_s3, 4  ;;  %s290_s7 = int_to_ptr.vmem [resolvable:$true] %s289_s7  ;;  %s292_s10 = int_to_ptr.hbm [resolvable:$true] %s291_s10 }
  0x15   :  { %320 = vpow2.f32 %v237_v4  ;;  %v91_v27 = vld [vmem:[#allocation6 + $0x50] sm:$0xff]  ;;  %v102_v28 = vld [vmem:[#allocation8 + $0x28] sm:$0xff]  ;;  %v117_v31 = vsub.f32 %v85_v12, %v101_v24  ;;  %v92_v33 = vld [vmem:[#allocation6 + $0x58] sm:$0xff]  ;;  %v116_v41 = vsub.f32 %v84_v11, %v100_v23  ;;  %v131_v48 = vmul.f32 %v113_v25, %v113_v25 }
  0x16   :  { %322 = vpow2.f32 %v201_v5  ;;  %v103_v29 = vld [vmem:[#allocation8 + $0x30] sm:$0xff]  ;;  %v104_v34 = vld [vmem:[#allocation8 + $0x38] sm:$0xff]  ;;  %v105_v35 = vld [vmem:[#allocation8 + $0x40] sm:$0xff]  ;;  %v118_v42 = vsub.f32 %v86_v13, %v102_v28  ;;  %v133_v54 = vmul.f32 %v115_v30, %v115_v30  ;;  %v132_v59 = vmul.f32 %v114_v36, %v114_v36 }
  0x17   :  { %v93_v38 = vld [vmem:[#allocation6 + $0x60] sm:$0xff]  ;;  %v106_v39 = vld [vmem:[#allocation8 + $0x48] sm:$0xff]  ;;  %v107_v40 = vld [vmem:[#allocation8 + $0x50] sm:$0xff]  ;;  %v119_v43 = vsub.f32 %v87_v15, %v103_v29  ;;  %v120_v52 = vsub.f32 %v88_v20, %v104_v34  ;;  %v121_v53 = vsub.f32 %v89_v21, %v105_v35  ;;  %v135_v55 = vmul.f32 %v117_v31, %v117_v31 }
  0x18   :  { %v94_v45 = vld [vmem:[#allocation6 + $0x68] sm:$0xff]  ;;  %v95_v46 = vld [vmem:[#allocation6 + $0x70] sm:$0xff]  ;;  %v108_v47 = vld [vmem:[#allocation8 + $0x58] sm:$0xff]  ;;  %v122_v57 = vsub.f32 %v90_v26, %v106_v39  ;;  %v123_v58 = vsub.f32 %v91_v27, %v107_v40  ;;  %v134_v61 = vmul.f32 %v116_v41, %v116_v41  ;;  %v136_v62 = vmul.f32 %v118_v42, %v118_v42 }
  0x19   :  { %230 = vrot.lane.b32.xlu0 %v468_v0, %s435_s28  ;;  %v109_v49 = vld [vmem:[#allocation8 + $0x60] sm:$0xff]  ;;  %v110_v50 = vld [vmem:[#allocation8 + $0x68] sm:$0xff]  ;;  %v111_v51 = vld [vmem:[#allocation8 + $0x70] sm:$0xff]  ;;  %v124_v60 = vsub.f32 %v92_v33, %v108_v47  ;;  %v137_v63 = vmul.f32 %v119_v43, %v119_v43  ;;  %v148_v4 = vsel %vm78_vm0, %v131_v48, 0.0  ;;  %v138_v9 = vmul.f32 %v120_v52, %v120_v52 }
  0x1a   :  { %v125_v1 = vsub.f32 %v93_v38, %v109_v49  ;;  %v126_v2 = vsub.f32 %v94_v45, %v110_v50  ;;  %v127_v3 = vsub.f32 %v95_v46, %v111_v51  ;;  %v96_v6 = vld [vmem:[#allocation6 + $0x78] sm:$0xff]  ;;  %v139_v10 = vmul.f32 %v121_v53, %v121_v53 }
  0x1b   :  { %v478_v7 = vpop.eup %320  ;;  %v112_v8 = vld [vmem:[#allocation8 + $0x78] sm:$0xff]  ;;  %v149_v11 = vsel %vm78_vm0, %v133_v54, 0.0  ;;  %v151_v12 = vsel %vm78_vm0, %v135_v55, 0.0  ;;  %v140_v15 = vmul.f32 %v122_v57, %v122_v57  ;;  %v141_v16 = vmul.f32 %v123_v58, %v123_v58  ;;  %v129_v55 = vld [vmem:[#allocation2] sm:$0xff] }
  0x1c   :  { %v323_v18 = vpop.eup %322  ;;  %v239_v19 = vadd.f32 1.0, %v478_v7  ;;  %v242_v32 = vmul.f32 -0.5, %v478_v7  ;;  %v245_v44 = vand.u32 2147483647, %v478_v7  ;;  %v150_v17 = vadd.f32 %v149_v11, %v148_v4 }
  0x1d   :  { %v203_v37 = vsub.f32 %v481_v14, %v323_v18  ;;  %v153_v18 = vsel %vm78_vm0, %v137_v63, 0.0  ;;  %v164_v20 = vsel %vm78_vm0, %v134_v61, 0.0  ;;  %v166_v21 = vsel %vm78_vm0, %v136_v62, 0.0 }
  0x1e   :  { %324 = vlog2.f32 %v239_v19  ;;  %v243_v56 = vadd.f32 1.0, %v242_v32  ;;  %v163_v19 = vsel %vm78_vm0, %v132_v59, 0.0  ;;  %v128_v23 = vsub.f32 %v96_v6, %v112_v8 }
  0x1f   :  { %v152_v24 = vadd.f32 %v151_v12, %v150_v17  ;;  %v165_v25 = vadd.f32 %v164_v20, %v163_v19  ;;  %v142_v26 = vmul.f32 %v124_v60, %v124_v60  ;;  %v143_v27 = vmul.f32 %v125_v1, %v125_v1 }
  0x20   :  { %v155_v28 = vsel %vm78_vm0, %v139_v10, 0.0  ;;  %v168_v29 = vsel %vm78_vm0, %v138_v9, 0.0  ;;  %v244_v31 = vmul.f32 %v478_v7, %v243_v56  ;;  %v144_v34 = vmul.f32 %v126_v2, %v126_v2 }
  0x21   :  { %v154_v32 = vadd.f32 %v153_v18, %v152_v24  ;;  %v167_v33 = vadd.f32 %v166_v21, %v165_v25  ;;  %v145_v35 = vmul.f32 %v127_v3, %v127_v3  ;;  %v157_v36 = vsel %vm78_vm0, %v141_v16, 0.0 }
  0x22   :  { %v228_v38 = vmax.f32 %v468_v0, 0.0  ;;  %vm501_vm2 = vcmp.lt.f32.partialorder %v245_v44, 0.0004427343  ;;  %v146_v43 = vmul.f32 %v128_v23, %v128_v23  ;;  %v159_v7 = vsel %vm78_vm0, %v143_v27, 0.0 }
  0x23   :  { %v156_v40 = vadd.f32 %v155_v28, %v154_v32  ;;  %v169_v41 = vadd.f32 %v168_v29, %v167_v33  ;;  %v172_v45 = vsel %vm78_vm0, %v142_v26, 0.0  ;;  %v161_v44 = vsel %vm78_vm0, %v145_v35, 0.0 }
  0x24   :  { %v325_v13 = vpop.eup %324  ;;  %v174_v50 = vsel %vm78_vm0, %v144_v34, 0.0  ;;  %v176_v56 = vsel %vm78_vm0, %v146_v43, 0.0  ;;  %v268_v35 = vlaneseq }
  0x25   :  { %v241_v30 = vmul.f32 0.6931472, %v325_v13  ;;  %v158_v47 = vadd.f32 %v157_v36, %v156_v40 }
  0x26   :  { %v271_v36 = vand.u32 127, %v268_v35 }
  0x27   :  { %v247_v49 = vsel %vm501_vm2, %v244_v31, %v241_v30  ;;  %v160_v52 = vadd.f32 %v159_v7, %v158_v47 }
  0x28   :  { %vm274_vm5 = vcmp.eq.s32.totalorder %v271_v36, 2  ;;  %vm273_vm6 = vcmp.eq.s32.totalorder %v271_v36, 1  ;;  %vm272_vm7 = vcmp.eq.s32.totalorder %v271_v36, 0 }
  0x29   :  { %v162_v58 = vadd.f32 %v161_v44, %v160_v52 }
  0x2b   :  { %v178_v62 = vadd.f32 %v162_v58, %v129_v55 }
  0x2d   :  { %180 = vst.msk [vmem:[#allocation2] sm:$0xff] %vm78_vm0, %v178_v62 }
  0x34   :  { %v185_v1 = vld [vmem:[#allocation2] sm:$0xff] }
  0x35   :  { %v187_v3 = vsel %vm78_vm0, %v185_v1, 0.0 }
  0x81   :  { %v250_v54 = vpop.permute.xlu1 %249 }
  0x83   :  { %v207_v5 = vpop.permute.xlu0 %206 }
  0x84   :  { %v209_v14 = vsub.f32 %v203_v37, %v207_v5  ;;  %v170_v37 = vsel %vm78_vm0, %v140_v15, 0.0 }
  0x85   :  { %v171_v48 = vadd.f32 %v170_v37, %v169_v41  ;;  %v269_v37 = vshrl.u32 %v268_v35, 7 }
  0x86   :  { %v211_v22 = vsel %vm210_vm1, %v209_v14, 0.0 }
  0x87   :  { %212 = vadd.xlane.f32.xlu1 %v211_v22  ;;  %v173_v53 = vadd.f32 %v172_v45, %v171_v48  ;;  %vm281_vm8 = vcmp.eq.s32.totalorder %v269_v37, 0 }
  0x89   :  { %v175_v59 = vadd.f32 %v174_v50, %v173_v53 }
  0x8b   :  { %v231_v42 = vpop.permute.xlu0 %230  ;;  %v177_v61 = vadd.f32 %v176_v56, %v175_v59 }
  0x8c   :  { %v233_v46 = vmul.f32 %v231_v42, %v468_v0  ;;  %v130_v0 = vld [vmem:[#allocation2 + $0x8] sm:$0xff] }
  0x8d   :  { %v179_v63 = vadd.f32 %v177_v61, %v130_v0 }
  0x8e   :  { %v234_v51 = vsub.f32 %v228_v38, %v233_v46 }
  0x8f   :  { %181 = vst.msk [vmem:[#allocation2 + $0x8] sm:$0xff] %vm78_vm0, %v179_v63 }
  0x90   :  { %v248_v57 = vadd.f32 %v247_v49, %v234_v51 }
  0x92   :  { %v252_v60 = vmul.f32 %v250_v54, %v248_v57 }
  0x94   :  { %254 = vrot.lane.b32.xlu2 %v252_v60, %s437_s29 }
  0x96   :  { %v186_v2 = vld [vmem:[#allocation2 + $0x8] sm:$0xff] }
  0x97   :  { %v188_v4 = vsel %vm78_vm0, %v186_v2, 0.0 }
  0x98   :  { %v189_v5 = vadd.f32 %v188_v4, %v187_v3 }
  0xbd   :  { %190 = vadd.xlane.f32.xlu2 %v189_v5 }
  0xee   :  { %v255_v6 = vpop.permute.xlu2 %254 }
  0xef   :  { %v258_v8 = vsel %vm257_vm3, %v255_v6, 0.0 }
  0xf0   :  { %259 = vadd.xlane.f32.xlu2 %v258_v8 }
  0xfa   :  { %v213_v9 = vpop.xlane.xlu1 %212 }
  0xfb   :  { %v214_v10 = vmul.f32 -0.5, %v213_v9 }
  0xfd   :  { %v302_v11 = vadd.f32 -0.5, %v214_v10 }
  0xff   :  { %v216_v12 = vand.u32 2147483647, %v302_v11 }
 0x101   :  { %v218_v13 = vsel %vm217_vm4, %v216_v12, 0.0 }
 0x102   :  { %219 = vadd.xlane.f32.xlu0 %v218_v13 }
 0x130   :  { %v191_v14 = vpop.xlane.xlu2 %190 }
 0x131   :  { %v192_v15 = vrot.slane %v191_v14, 4 }
 0x133   :  { %v193_v16 = vadd.f32 %v192_v15, %v191_v14 }
 0x135   :  { %v194_v17 = vrot.slane %v193_v16, 2 }
 0x137   :  { %v195_v18 = vadd.f32 %v194_v17, %v193_v16 }
 0x139   :  { %v196_v19 = vrot.slane %v195_v18, 1 }
 0x13b   :  { %v197_v20 = vadd.f32 %v196_v19, %v195_v18 }
 0x13d   :  { %303 = vpush %v197_v20 }
 0x163   :  { %v260_v21 = vpop.xlane.xlu2 %259 }
 0x164   :  { %v261_v22 = vrot.slane %v260_v21, 4 }
 0x166   :  { %v262_v23 = vadd.f32 %v261_v22, %v260_v21 }
 0x168   :  { %v263_v24 = vrot.slane %v262_v23, 2 }
 0x16a   :  { %v264_v28 = vadd.f32 %v263_v24, %v262_v23 }
 0x16c   :  { %v265_v31 = vrot.slane %v264_v28, 1 }
 0x16e   :  { %v266_v34 = vadd.f32 %v265_v31, %v264_v28  ;;  %s304_s30 = spop %303 }
 0x16f   :  { %v279_v41 = vstv %s304_s30 }
 0x175   :  { %v220_v25 = vpop.xlane.xlu0 %219 }
 0x176   :  { %v221_v26 = vrot.slane %v220_v25, 4 }
 0x178   :  { %v222_v27 = vadd.f32 %v221_v26, %v220_v25 }
 0x17a   :  { %v223_v29 = vrot.slane %v222_v27, 2 }
 0x17c   :  { %v224_v30 = vadd.f32 %v223_v29, %v222_v27 }
 0x17e   :  { %v225_v32 = vrot.slane %v224_v30, 1 }
 0x180   :  { %v226_v33 = vadd.f32 %v225_v32, %v224_v30 }
 0x182   :  { %305 = vpush %v226_v33 }
 0x183   :  { %307 = vpush %v266_v34 }
 0x1b3   :  { %s306_s4 = spop %305 }
 0x1b4   :  { %v277_v38 = vstv %s306_s4  ;;  %s308_s5 = spop %307 }
 0x1b5   :  { %v275_v39 = vstv %s308_s5 }
 0x1b6   :  { %v276_v40 = vsel %vm274_vm5, %v275_v39, 0.0 }
 0x1b7   :  { %v278_v42 = vsel %vm273_vm6, %v277_v38, %v276_v40 }
 0x1b8   :  { %v280_v43 = vsel %vm272_vm7, %v279_v41, %v278_v42 }
 0x1b9   :  { %v282_v7 = vsel %vm281_vm8, %v280_v43, 0.0 }
 0x1ba   :  { %283 = vst [vmem:[#allocation9] sm:$0xff] %v282_v7 }
 0x1bb   :  { %294 = dma.vmem_to_hbm [thread:$0]  %s290_s7, 128, %s292_s10, [#allocation5]  }
 0x1bc   :  { %426 = dma.done.wait [#allocation5], 128  }
 0x1bd   :  { %427 = vsyncadd [#allocation5], 4294967168 }
 0x1be   :  { %299 = vsyncpa [#allocation4], 1 }
 0x1bf   :  { %300 = vsyncpa [#allocation7], 1 }
 0x1c0   :  { %301 = vsyncpa [#allocation5], 1 }

</bundles_post_ra>
